<compile_context>
chip_gen: v5e
topology: v5e:2x2
jax: 0.10.0
libtpu: 0.0.40
codegen_flags: <defaults>
</compile_context>

<pallas_src>
import jax
import jax.numpy as jnp
from jax.experimental import pallas as pl
from jax.experimental.pallas import tpu as pltpu


# ----------------------------------------------------------------------------------------------
# Kernel: per-batch transpose (HW, C) -> (C, HW)
# ----------------------------------------------------------------------------------------------
def _patch_unembed_kernel(x_ref, o_ref):
    # x_ref block: (1, HW, C)   o_ref block: (1, C, HW)
    o_ref[0] = jnp.transpose(x_ref[0], (1, 0))


def patch_unembed(x, x_size, nc):
    """x: (B, HW, C) float array; x_size = (H, W); nc == C. Returns (B, nc, H, W)."""
    B, HW, C = x.shape
    H, W = int(x_size[0]), int(x_size[1])
    assert C == nc and HW == H * W, "PatchUnEmbed shape mismatch"

    out_chw = pl.pallas_call(
        _patch_unembed_kernel,
        out_shape=jax.ShapeDtypeStruct((B, C, HW), x.dtype),
        grid=(B,),
        in_specs=[pl.BlockSpec((1, HW, C), lambda b: (b, 0, 0))],
        out_specs=pl.BlockSpec((1, C, HW), lambda b: (b, 0, 0)),
        compiler_params=pltpu.CompilerParams(dimension_semantics=("parallel",)),
    )(x)

    # .view(B, nc, H, W): splitting the trailing contiguous HW axis is a metadata-only reshape
    # (no copy, no kernel needed).
    return out_chw.reshape(B, nc, H, W)


# ----------------------------------------------------------------------------------------------
# Pure-JAX reference
# ----------------------------------------------------------------------------------------------
def _ref_patch_unembed(x, x_size, nc):
    B, HW, C = x.shape
    return jnp.transpose(x, (0, 2, 1)).reshape(B, nc, x_size[0], x_size[1])


if __name__ == "__main__":
    key = jax.random.PRNGKey(0)
    B, C, H, W = 2, 32, 16, 16          # basefilter nc = C = 32, 16x16 spatial -> HW = 256 tokens
    HW = H * W
    x = jax.random.normal(key, (B, HW, C), jnp.float32)

    fn = jax.jit(lambda t: patch_unembed(t, (H, W), C))
    out = jax.block_until_ready(fn(x))

    ref = _ref_patch_unembed(x, (H, W), C)
    assert out.shape == (B, C, H, W), out.shape
    assert bool(jnp.all(jnp.isfinite(out)))
    assert bool(jnp.array_equal(out, ref)), float(jnp.max(jnp.abs(out - ref)))

    print("KERNEL_OK")
</pallas_src>

<mosaic_0001>
module attributes {stable_mosaic.version = 11 : i64} {
  func.func @_patch_unembed_kernel(%arg0: i32, %arg1: memref<1x256x32xf32, #tpu.memory_space<vmem>>, %arg2: memref<1x32x256xf32, #tpu.memory_space<vmem>>) attributes {dimension_semantics = [#tpu.dimension_semantics<parallel>], iteration_bounds = array<i64: 2>, scalar_prefetch = 0 : i64, scratch_operands = 0 : i64, tpu.core_type = #tpu.core_type<tc>, window_params = [{transform_indices = @transform_0, window_bounds = array<i64: 1, 256, 32>}, {transform_indices = @transform_1, window_bounds = array<i64: 1, 32, 256>}]} {
    %c0 = arith.constant 0 : index
    %c0_0 = arith.constant 0 : index
    %c0_1 = arith.constant 0 : index
    %0 = vector.load %arg1[%c0, %c0_0, %c0_1] : memref<1x256x32xf32, #tpu.memory_space<vmem>>, vector<1x256x32xf32>
    %1 = vector.shape_cast %0 : vector<1x256x32xf32> to vector<256x32xf32>
    %2 = tpu.transpose %1, [1, 0] : vector<256x32xf32> -> vector<32x256xf32>
    %c0_2 = arith.constant 0 : index
    %c0_3 = arith.constant 0 : index
    %c0_4 = arith.constant 0 : index
    %3 = vector.load %arg2[%c0_2, %c0_3, %c0_4] : memref<1x32x256xf32, #tpu.memory_space<vmem>>, vector<1x32x256xf32>
    %4 = vector.shape_cast %3 : vector<1x32x256xf32> to vector<32x256xf32>
    %5 = vector.shape_cast %2 : vector<32x256xf32> to vector<1x32x256xf32>
    tpu.vector_store %arg2[%c0_2, %c0_3, %c0_4], %5 {strides = array<i32>} : memref<1x32x256xf32, #tpu.memory_space<vmem>>, vector<1x32x256xf32>,
    return
  }
  func.func @transform_0(%arg0: i32) -> (i32, i32, i32) {
    %c0_i32 = arith.constant 0 : i32
    %c0_i32_0 = arith.constant 0 : i32
    %c0_i32_1 = arith.constant 0 : i32
    return %arg0, %c0_i32, %c0_i32_0 : i32, i32, i32
  }
  func.func @transform_1(%arg0: i32) -> (i32, i32, i32) {
    %c0_i32 = arith.constant 0 : i32
    %c0_i32_0 = arith.constant 0 : i32
    %c0_i32_1 = arith.constant 0 : i32
    return %arg0, %c0_i32, %c0_i32_0 : i32, i32, i32
  }
}

</mosaic_0001>

<bundles_post_ra>
// kernel: _lambda_.1
= control target key start
LH: loop header
LB: loop body
LE: loop exit
PB: predicated region body
PF: predicated region fallthrough
CT: control target
= control target key end

     0   :  { %s315_s6 = smov 0   ;;  %s370_s0 = inlined_call_operand.vmem [shape: f32[2,256,32], index: 0, kind: input, shape index: {}]   ;;  %s371_s1 = inlined_call_operand.vmem [shape: f32[2,32,256], index: 1, kind: output, shape index: {}]  }
   0x1 LB: > { %s276_s7 = sadd.s32 4294967295, %s303_s6   ;;  %p280_p0 = scmp.ge.s32.totalorder %s303_s6, 1  ;;  %s303_s6 = sphi %s315_s6, %s11_s6  }
   0x2   : > { %p87_p1 = scmp.lt.s32.totalorder %s303_s6, 3 }
   0x4   : > { %p88_p2 = pnand %p280_p0, %p87_p1 }
   0x5   : > { %p107_p3 = scmp.lt.s32.totalorder (!%p88_p2), %s276_s7, 1 }
   0x6   : > { %91 = sbr.rel (%p88_p2) target bundleno = 206 (0xce), region = 24 }
   0xb   : > { %s373_s7 = smov (!%p107_p3, %s276_s7), 1 }
   0xc   : > { %s287_s8 = sshll.u32 %s373_s7, 8  ;;  %s288_s12 = sshll.u32 %s373_s7, 6 }
   0xd   : > { %s329_s11 = scalar_lea.vmem %s370_s0, %s287_s8  ;;  %s116_s15 = scalar_lea.vmem %s371_s1, %s288_s12 }
   0xe   : > { %v133_v0 = vld [vmem:[%s329_s11 + $0x80] sm:$0xff]  ;;  %v134_v2 = vld [vmem:[%s329_s11 + $0x88] sm:$0xff]  ;;  %v135_v4 = vld [vmem:[%s329_s11 + $0x90] sm:$0xff] }
   0xf   : > { %v117_v1 = vld [vmem:[%s329_s11] sm:$0xff]  ;;  %181 = vxpose.xlu1.b32.start [1/16] (narrow) %v133_v0, 32  ;;  %v118_v3 = vld [vmem:[%s329_s11 + $0x8] sm:$0xff]  ;;  %v119_v5 = vld [vmem:[%s329_s11 + $0x10] sm:$0xff] }
  0x10   : > { %149 = vxpose.xlu0.b32.start [1/16] (narrow) %v117_v1, 32  ;;  %v136_v6 = vld [vmem:[%s329_s11 + $0x98] sm:$0xff]  ;;  %v137_v8 = vld [vmem:[%s329_s11 + $0xa0] sm:$0xff]  ;;  %v138_v10 = vld [vmem:[%s329_s11 + $0xa8] sm:$0xff] }
  0x11   : > { %v120_v7 = vld [vmem:[%s329_s11 + $0x18] sm:$0xff]  ;;  %v121_v9 = vld [vmem:[%s329_s11 + $0x20] sm:$0xff]  ;;  %v122_v11 = vld [vmem:[%s329_s11 + $0x28] sm:$0xff] }
  0x12   : > { %v139_v12 = vld [vmem:[%s329_s11 + $0xb0] sm:$0xff]  ;;  %v140_v14 = vld [vmem:[%s329_s11 + $0xb8] sm:$0xff]  ;;  %v141_v16 = vld [vmem:[%s329_s11 + $0xc0] sm:$0xff] }
  0x13   : > { %v123_v13 = vld [vmem:[%s329_s11 + $0x30] sm:$0xff]  ;;  %v124_v15 = vld [vmem:[%s329_s11 + $0x38] sm:$0xff]  ;;  %v125_v17 = vld [vmem:[%s329_s11 + $0x40] sm:$0xff] }
  0x14   : > { %v142_v18 = vld [vmem:[%s329_s11 + $0xc8] sm:$0xff]  ;;  %v143_v20 = vld [vmem:[%s329_s11 + $0xd0] sm:$0xff]  ;;  %v144_v22 = vld [vmem:[%s329_s11 + $0xd8] sm:$0xff] }
  0x15   : > { %v126_v19 = vld [vmem:[%s329_s11 + $0x48] sm:$0xff]  ;;  %v127_v21 = vld [vmem:[%s329_s11 + $0x50] sm:$0xff]  ;;  %v128_v23 = vld [vmem:[%s329_s11 + $0x58] sm:$0xff] }
  0x16   : > { %v145_v24 = vld [vmem:[%s329_s11 + $0xe0] sm:$0xff]  ;;  %v146_v26 = vld [vmem:[%s329_s11 + $0xe8] sm:$0xff]  ;;  %v147_v28 = vld [vmem:[%s329_s11 + $0xf0] sm:$0xff] }
  0x17   : > { %182 = vxpose.xlu1.b32.cont [2/16] (narrow) %v134_v2, 32  ;;  %v129_v25 = vld [vmem:[%s329_s11 + $0x60] sm:$0xff]  ;;  %v130_v27 = vld [vmem:[%s329_s11 + $0x68] sm:$0xff]  ;;  %v131_v29 = vld [vmem:[%s329_s11 + $0x70] sm:$0xff] }
  0x18   : > { %150 = vxpose.xlu0.b32.cont [2/16] (narrow) %v118_v3, 32  ;;  %v148_v30 = vld [vmem:[%s329_s11 + $0xf8] sm:$0xff] }
  0x19   : > { %v132_v31 = vld [vmem:[%s329_s11 + $0x78] sm:$0xff] }
  0x1f   : > { %183 = vxpose.xlu1.b32.cont [3/16] (narrow) %v135_v4, 32 }
  0x20   : > { %151 = vxpose.xlu0.b32.cont [3/16] (narrow) %v119_v5, 32 }
  0x27   : > { %184 = vxpose.xlu1.b32.cont [4/16] (narrow) %v136_v6, 32 }
  0x28   : > { %152 = vxpose.xlu0.b32.cont [4/16] (narrow) %v120_v7, 32 }
  0x2f   : > { %185 = vxpose.xlu1.b32.cont [5/16] (narrow) %v137_v8, 32 }
  0x30   : > { %153 = vxpose.xlu0.b32.cont [5/16] (narrow) %v121_v9, 32 }
  0x37   : > { %186 = vxpose.xlu1.b32.cont [6/16] (narrow) %v138_v10, 32 }
  0x38   : > { %154 = vxpose.xlu0.b32.cont [6/16] (narrow) %v122_v11, 32 }
  0x3f   : > { %187 = vxpose.xlu1.b32.cont [7/16] (narrow) %v139_v12, 32 }
  0x40   : > { %155 = vxpose.xlu0.b32.cont [7/16] (narrow) %v123_v13, 32 }
  0x47   : > { %188 = vxpose.xlu1.b32.cont [8/16] (narrow) %v140_v14, 32 }
  0x48   : > { %156 = vxpose.xlu0.b32.cont [8/16] (narrow) %v124_v15, 32 }
  0x4f   : > { %189 = vxpose.xlu1.b32.cont [9/16] (narrow) %v141_v16, 32 }
  0x50   : > { %157 = vxpose.xlu0.b32.cont [9/16] (narrow) %v125_v17, 32 }
  0x57   : > { %190 = vxpose.xlu1.b32.cont [10/16] (narrow) %v142_v18, 32 }
  0x58   : > { %158 = vxpose.xlu0.b32.cont [10/16] (narrow) %v126_v19, 32 }
  0x5f   : > { %191 = vxpose.xlu1.b32.cont [11/16] (narrow) %v143_v20, 32 }
  0x60   : > { %159 = vxpose.xlu0.b32.cont [11/16] (narrow) %v127_v21, 32 }
  0x67   : > { %192 = vxpose.xlu1.b32.cont [12/16] (narrow) %v144_v22, 32 }
  0x68   : > { %160 = vxpose.xlu0.b32.cont [12/16] (narrow) %v128_v23, 32 }
  0x6f   : > { %193 = vxpose.xlu1.b32.cont [13/16] (narrow) %v145_v24, 32 }
  0x70   : > { %161 = vxpose.xlu0.b32.cont [13/16] (narrow) %v129_v25, 32 }
  0x77   : > { %194 = vxpose.xlu1.b32.cont [14/16] (narrow) %v146_v26, 32 }
  0x78   : > { %162 = vxpose.xlu0.b32.cont [14/16] (narrow) %v130_v27, 32 }
  0x7f   : > { %195 = vxpose.xlu1.b32.cont [15/16] (narrow) %v147_v28, 32 }
  0x80   : > { %163 = vxpose.xlu0.b32.cont [15/16] (narrow) %v131_v29, 32 }
  0x87   : > { %196 = vxpose.xlu1.b32.end [16/16] (narrow) %v148_v30, 32 }
  0x88   : > { %164 = vxpose.xlu0.b32.end [16/16] (narrow) %v132_v31, 32 }
  0xb3   : > { %v197_v32 = vpop.trf.xlu1 }
  0xb4   : > { %v165_v33 = vpop.trf.xlu0  ;;  %214 = vst [vmem:[%s116_s15 + $0x8] sm:$0xff] %v197_v32 }
  0xb5   : > { %213 = vst [vmem:[%s116_s15] sm:$0xff] %v165_v33 }
  0xbb   : > { %v198_v34 = vpop.trf.xlu1 }
  0xbc   : > { %v166_v35 = vpop.trf.xlu0  ;;  %216 = vst [vmem:[%s116_s15 + $0x18] sm:$0xff] %v198_v34 }
  0xbd   : > { %215 = vst [vmem:[%s116_s15 + $0x10] sm:$0xff] %v166_v35 }
  0xc3   : > { %v199_v36 = vpop.trf.xlu1 }
  0xc4   : > { %v167_v37 = vpop.trf.xlu0  ;;  %218 = vst [vmem:[%s116_s15 + $0x28] sm:$0xff] %v199_v36 }
  0xc5   : > { %217 = vst [vmem:[%s116_s15 + $0x20] sm:$0xff] %v167_v37 }
  0xcb   : > { %v200_v38 = vpop.trf.xlu1 }
  0xcc   : > { %v168_v39 = vpop.trf.xlu0  ;;  %220 = vst [vmem:[%s116_s15 + $0x38] sm:$0xff] %v200_v38 }
  0xcd   : > { %219 = vst [vmem:[%s116_s15 + $0x30] sm:$0xff] %v168_v39 }
  0xce PF: > { %s11_s6 = sadd.s32 1, %s303_s6  }
  0xcf   : > { %p8_p4 = scmp.ge.s32.totalorder %s11_s6, 4  }
  0xd1   :  { %10 = sbr.rel (!%p8_p4) target bundleno = 1 (0x1), region = 54 }

</bundles_post_ra>
